<compile_context>
chip_gen: v6e
topology: v6e:2x2x1
jax: 0.10.0
libtpu: 0.0.40
codegen_flags: <defaults>
</compile_context>

<pallas_src>
import functools

import jax
import jax.numpy as jnp
from jax import lax
from jax.experimental import pallas as pl
from jax.experimental.pallas import tpu as pltpu


def _round_up(x, m):
    return ((x + m - 1) // m) * m


# ---------------------------------------------------------------------------
# Kernel
# ---------------------------------------------------------------------------
def _mlp_kernel(x_ref, p_ref, o_ref, *, d, off_w2, off_w3, off_v):
    """Fused in->64->32->16->1 MLP on one (tb, d) batch tile.

    p_ref packs all weights/biases (f32, 128 lanes wide):
      rows [0, d)               cols [0, 64) : w1
      rows [off_w2, off_w2+64)  cols [0, 32) : w2
      rows [off_w3, off_w3+32)  cols [0, 16) : w3
      row  off_v                cols [0, 64) : b1
      row  off_v+1              cols [0, 32) : b2
      row  off_v+2              cols [0, 16) : b3
      row  off_v+3              cols [0, 16) : w4^T
      row  off_v+4              col  0       : b4
    """
    f32 = jnp.float32
    x = x_ref[...]                                                      # (tb, d) f32

    h = jnp.dot(x, p_ref[0:d, 0:64], preferred_element_type=f32)
    h = jnp.maximum(h + p_ref[off_v:off_v + 1, 0:64], 0.0)             # (tb, 64)

    h = jnp.dot(h, p_ref[off_w2:off_w2 + 64, 0:32], preferred_element_type=f32)
    h = jnp.maximum(h + p_ref[off_v + 1:off_v + 2, 0:32], 0.0)         # (tb, 32)

    h = jnp.dot(h, p_ref[off_w3:off_w3 + 32, 0:16], preferred_element_type=f32)
    h = jnp.maximum(h + p_ref[off_v + 2:off_v + 3, 0:16], 0.0)         # (tb, 16)

    # Final layer computed transposed: (1,16) . (tb,16)^T -> (1, tb) => lane-dense store.
    out_t = lax.dot_general(
        p_ref[off_v + 3:off_v + 4, 0:16], h,
        dimension_numbers=(((1,), (1,)), ((), ())),
        preferred_element_type=f32)                                     # (1, tb)
    o_ref[...] = out_t + p_ref[off_v + 4:off_v + 5, 0:1]


# ---------------------------------------------------------------------------
# Wrapper
# ---------------------------------------------------------------------------
def _layout_offsets(d):
    off_w2 = _round_up(d, 8)
    off_w3 = off_w2 + 64
    off_v = off_w3 + 32
    rows = _round_up(off_v + 5, 8)
    return off_w2, off_w3, off_v, rows


def pack_params(params):
    """One-time packing of all weights/biases into a single lane-padded f32 constant."""
    d = params["w1"].shape[0]
    off_w2, off_w3, off_v, rows = _layout_offsets(d)
    p = jnp.zeros((rows, 128), jnp.float32)
    p = p.at[0:d, 0:64].set(params["w1"].astype(jnp.float32))
    p = p.at[off_w2:off_w2 + 64, 0:32].set(params["w2"].astype(jnp.float32))
    p = p.at[off_w3:off_w3 + 32, 0:16].set(params["w3"].astype(jnp.float32))
    p = p.at[off_v, 0:64].set(params["b1"].reshape(64).astype(jnp.float32))
    p = p.at[off_v + 1, 0:32].set(params["b2"].reshape(32).astype(jnp.float32))
    p = p.at[off_v + 2, 0:16].set(params["b3"].reshape(16).astype(jnp.float32))
    p = p.at[off_v + 3, 0:16].set(params["w4"].reshape(16).astype(jnp.float32))
    p = p.at[off_v + 4, 0].set(params["b4"].reshape(()).astype(jnp.float32))
    return p


def _pick_tile(b128, d):
    """Largest lane-aligned batch tile keeping >= ~4 grid steps, within a VMEM budget."""
    tb = _round_up(pl.cdiv(b128, 4), 128)                 # >= 4 steps (2 per v7x TensorCore)
    vmem_rows = (4 << 20) // (4 * (d + 64 + 32 + 16))     # x row + h1+h2+h3 rows, ~4 MiB/buffer
    vmem_cap = max(128, (vmem_rows // 128) * 128)
    return int(max(128, min(tb, 4096, vmem_cap)))


@jax.jit
def red_neuronal_forward(x, packed):
    """x: (B, input_dim) float32. packed: output of pack_params()."""
    B, d = x.shape
    off_w2, off_w3, off_v, _ = _layout_offsets(d)

    tb = _pick_tile(_round_up(B, 128), d)
    b_pad = _round_up(B, tb)           # pad only when ragged; tb always divides b_pad
    if b_pad != B:
        x = jnp.pad(x, ((0, b_pad - B), (0, 0)))
    grid = (b_pad // tb,)

    kernel = functools.partial(_mlp_kernel, d=d, off_w2=off_w2, off_w3=off_w3, off_v=off_v)

    packed_bytes = int(packed.size) * 4
    flops = 2 * b_pad * (d * 64 + 64 * 32 + 32 * 16 + 16 * 1)
    bytes_accessed = b_pad * d * 4 + b_pad * 4 + packed_bytes

    # VMEM: double-buffered x tile & out slab, double-buffered packed constants,
    # h1/h2/h3 intermediates, plus headroom for Mosaic internal scratch.
    vmem_need = (2 * (tb * d * 4 + tb * 4) + 2 * packed_bytes
                 + tb * (64 + 32 + 16) * 4 + (2 << 20))
    vmem_limit = int(min(max(vmem_need, 4 << 20), 32 << 20))   # <= half of v7x's 64 MiB

    out_t = pl.pallas_call(
        kernel,
        out_shape=jax.ShapeDtypeStruct((1, b_pad), jnp.float32),
        grid_spec=pltpu.PrefetchScalarGridSpec(
            num_scalar_prefetch=0,
            grid=grid,
            in_specs=[
                pl.BlockSpec((tb, d), lambda i: (i, 0)),        # streaming x tile
                pl.BlockSpec(packed.shape, lambda i: (0, 0)),   # constants, DMA'd once
            ],
            out_specs=pl.BlockSpec((1, tb), lambda i: (0, i)),  # lane-dense output slab
        ),
        compiler_params=pltpu.CompilerParams(
            dimension_semantics=("parallel",),
            vmem_limit_bytes=vmem_limit),
        cost_estimate=pl.CostEstimate(
            flops=flops, transcendentals=0, bytes_accessed=bytes_accessed),
    )(x, packed)

    return out_t[0, :B].reshape(B, 1)


# ---------------------------------------------------------------------------
# Init + reference
# ---------------------------------------------------------------------------
def init_params(key, input_dim):
    """Deterministic init mimicking nn.Linear (uniform +/- 1/sqrt(fan_in))."""
    dims = [(input_dim, 64), (64, 32), (32, 16), (16, 1)]
    params = {}
    for idx, (fan_in, fan_out) in enumerate(dims, start=1):
        key, kw, kb = jax.random.split(key, 3)
        bound = 1.0 / jnp.sqrt(jnp.float32(fan_in))
        params[f"w{idx}"] = jax.random.uniform(
            kw, (fan_in, fan_out), jnp.float32, -bound, bound)
        params[f"b{idx}"] = jax.random.uniform(
            kb, (1, fan_out), jnp.float32, -bound, bound)
    return params


def reference_forward(x, params):
    h = jnp.maximum(x @ params["w1"] + params["b1"], 0.0)
    h = jnp.maximum(h @ params["w2"] + params["b2"], 0.0)
    h = jnp.maximum(h @ params["w3"] + params["b3"], 0.0)
    return h @ params["w4"] + params["b4"]


if __name__ == "__main__":
    key = jax.random.PRNGKey(0)
    k_in, k_params = jax.random.split(key)

    batch, input_dim = 256, 32
    x = jax.random.normal(k_in, (batch, input_dim), jnp.float32)
    params = init_params(k_params, input_dim)
    packed = pack_params(params)          # hoisted one-time weight preprocessing

    out = jax.block_until_ready(red_neuronal_forward(x, packed))
    assert out.shape == (batch, 1)

    ref = reference_forward(x, params)
    # TPU MXU may evaluate f32 matmuls at default (bf16-pass) precision, so allow a
    # small tolerance against the pure-f32 reference.
    assert jnp.allclose(out, ref, atol=2e-2, rtol=2e-2)

    # Ragged batch (not a multiple of the tile) exercises the guarded pad path.
    out2 = jax.block_until_ready(red_neuronal_forward(x[:200], packed))
    assert out2.shape == (200, 1)
    assert jnp.allclose(out2, ref[:200], atol=2e-2, rtol=2e-2)

    print("KERNEL_OK")
</pallas_src>

<mosaic_0001>
module attributes {stable_mosaic.version = 11 : i64} {
  func.func @_mlp_kernel(%arg0: i32, %arg1: memref<128x32xf32, #tpu.memory_space<vmem>>, %arg2: memref<136x128xf32, #tpu.memory_space<vmem>>, %arg3: memref<1x128xf32, #tpu.memory_space<vmem>>) attributes {dimension_semantics = [#tpu.dimension_semantics<parallel>], iteration_bounds = array<i64: 2>, scalar_prefetch = 0 : i64, scratch_operands = 0 : i64, tpu.core_type = #tpu.core_type<tc>, window_params = [{transform_indices = @transform_0, window_bounds = array<i64: 128, 32>}, {pipeline_mode = #tpu.pipeline_mode<synchronous>, transform_indices = @transform_1, window_bounds = array<i64: 136, 128>}, {transform_indices = @transform_2, window_bounds = array<i64: 1, 128>}]} {
    %c0 = arith.constant 0 : index
    %c0_0 = arith.constant 0 : index
    %0 = vector.load %arg1[%c0, %c0_0] : memref<128x32xf32, #tpu.memory_space<vmem>>, vector<128x32xf32>
    %c0_1 = arith.constant 0 : index
    %c0_2 = arith.constant 0 : index
    %1 = vector.load %arg2[%c0_1, %c0_2] : memref<136x128xf32, #tpu.memory_space<vmem>>, vector<32x64xf32>
    %cst = arith.constant dense<0.000000e+00> : vector<128x64xf32>
    %2 = tpu.matmul %0, %1, %cst {dimension_numbers = #tpu.dot_dimension_numbers<[1], [0], [0], [1], [0, 0, 1, 1], [], []>} : vector<128x32xf32>, vector<32x64xf32>, vector<128x64xf32> -> vector<128x64xf32>
    %c128 = arith.constant 128 : index
    %c0_3 = arith.constant 0 : index
    %3 = vector.load %arg2[%c128, %c0_3] : memref<136x128xf32, #tpu.memory_space<vmem>>, vector<1x64xf32>
    %4 = vector.broadcast %3 : vector<1x64xf32> to vector<128x64xf32>
    %5 = arith.addf %2, %4 : vector<128x64xf32>
    %cst_4 = arith.constant 0.000000e+00 : f32
    %6 = vector.broadcast %cst_4 : f32 to vector<128x64xf32>
    %7 = arith.maximumf %5, %6 : vector<128x64xf32>
    %c32 = arith.constant 32 : index
    %c0_5 = arith.constant 0 : index
    %8 = vector.load %arg2[%c32, %c0_5] : memref<136x128xf32, #tpu.memory_space<vmem>>, vector<64x32xf32>
    %cst_6 = arith.constant dense<0.000000e+00> : vector<128x32xf32>
    %9 = tpu.matmul %7, %8, %cst_6 {dimension_numbers = #tpu.dot_dimension_numbers<[1], [0], [0], [1], [0, 0, 1, 1], [], []>} : vector<128x64xf32>, vector<64x32xf32>, vector<128x32xf32> -> vector<128x32xf32>
    %c129 = arith.constant 129 : index
    %c0_7 = arith.constant 0 : index
    %10 = vector.load %arg2[%c129, %c0_7] : memref<136x128xf32, #tpu.memory_space<vmem>>, vector<1x32xf32>
    %11 = vector.broadcast %10 : vector<1x32xf32> to vector<128x32xf32>
    %12 = arith.addf %9, %11 : vector<128x32xf32>
    %cst_8 = arith.constant 0.000000e+00 : f32
    %13 = vector.broadcast %cst_8 : f32 to vector<128x32xf32>
    %14 = arith.maximumf %12, %13 : vector<128x32xf32>
    %c96 = arith.constant 96 : index
    %c0_9 = arith.constant 0 : index
    %15 = vector.load %arg2[%c96, %c0_9] : memref<136x128xf32, #tpu.memory_space<vmem>>, vector<32x16xf32>
    %cst_10 = arith.constant dense<0.000000e+00> : vector<128x16xf32>
    %16 = tpu.matmul %14, %15, %cst_10 {dimension_numbers = #tpu.dot_dimension_numbers<[1], [0], [0], [1], [0, 0, 1, 1], [], []>} : vector<128x32xf32>, vector<32x16xf32>, vector<128x16xf32> -> vector<128x16xf32>
    %c130 = arith.constant 130 : index
    %c0_11 = arith.constant 0 : index
    %17 = vector.load %arg2[%c130, %c0_11] : memref<136x128xf32, #tpu.memory_space<vmem>>, vector<1x16xf32>
    %18 = vector.broadcast %17 : vector<1x16xf32> to vector<128x16xf32>
    %19 = arith.addf %16, %18 : vector<128x16xf32>
    %cst_12 = arith.constant 0.000000e+00 : f32
    %20 = vector.broadcast %cst_12 : f32 to vector<128x16xf32>
    %21 = arith.maximumf %19, %20 : vector<128x16xf32>
    %c131 = arith.constant 131 : index
    %c0_13 = arith.constant 0 : index
    %22 = vector.load %arg2[%c131, %c0_13] : memref<136x128xf32, #tpu.memory_space<vmem>>, vector<1x16xf32>
    %cst_14 = arith.constant dense<0.000000e+00> : vector<1x128xf32>
    %23 = tpu.matmul %22, %21, %cst_14 {dimension_numbers = #tpu.dot_dimension_numbers<[1], [1], [0], [0], [0, 0, 1, 0], [], []>} : vector<1x16xf32>, vector<128x16xf32>, vector<1x128xf32> -> vector<1x128xf32>
    %c132 = arith.constant 132 : index
    %c0_15 = arith.constant 0 : index
    %24 = vector.load %arg2[%c132, %c0_15] : memref<136x128xf32, #tpu.memory_space<vmem>>, vector<1x1xf32>
    %25 = vector.broadcast %24 : vector<1x1xf32> to vector<1x128xf32>
    %26 = arith.addf %23, %25 : vector<1x128xf32>
    %c0_16 = arith.constant 0 : index
    %c0_17 = arith.constant 0 : index
    %27 = vector.load %arg3[%c0_16, %c0_17] : memref<1x128xf32, #tpu.memory_space<vmem>>, vector<1x128xf32>
    tpu.vector_store %arg3[%c0_16, %c0_17], %26 {strides = array<i32>} : memref<1x128xf32, #tpu.memory_space<vmem>>, vector<1x128xf32>,
    return
  }
  func.func @transform_0(%arg0: i32) -> (i32, i32) {
    %c0_i32 = arith.constant 0 : i32
    %c0_i32_0 = arith.constant 0 : i32
    return %arg0, %c0_i32 : i32, i32
  }
  func.func @transform_1(%arg0: i32) -> (i32, i32) {
    %c0_i32 = arith.constant 0 : i32
    %c0_i32_0 = arith.constant 0 : i32
    %c0_i32_1 = arith.constant 0 : i32
    return %c0_i32, %c0_i32_0 : i32, i32
  }
  func.func @transform_2(%arg0: i32) -> (i32, i32) {
    %c0_i32 = arith.constant 0 : i32
    %c0_i32_0 = arith.constant 0 : i32
    return %c0_i32, %arg0 : i32, i32
  }
}

</mosaic_0001>

<bundles_post_ra>
// kernel: red_neuronal_forward.1
= control target key start
LH: loop header
LB: loop body
LE: loop exit
PB: predicated region body
PF: predicated region fallthrough
CT: control target
= control target key end

     0   :  { %7 = vsyncpa [#allocation3], 0  ;;  %s1702_s0 = inlined_call_operand.vmem [shape: f32[256,32], index: 0, kind: input, shape index: {}]   ;;  %s1703_s1 = inlined_call_operand.vmem [shape: f32[136,128], index: 1, kind: input, shape index: {}]   ;;  %s1704_s2 = inlined_call_operand.hbm [shape: f32[1,256], index: 2, kind: output, shape index: {}]  }
   0x1   :  { %9 = vsyncpa [#allocation3 + $0x1], 0  ;;  %s1438_s9 = smov 0   ;;  %s1440_s10 = smov 0  }
   0x2   :  { %s1442_s11 = smov 0   ;;  %s1444_s12 = smov 0  }
   0x3 LB: > { %s1016_s13 = sadd.s32 4294967295, %s1417_s12   ;;  %s1017_s14 = sadd.s32 4294967294, %s1417_s12   ;;  %s1417_s12 = sphi %s1444_s12, %s1710_s12   ;;  %s1413_s11 = sphi %s1442_s11, %s1709_s11   ;;  %s1409_s10 = sphi %s1440_s10, %s1708_s10   ;;  %s1405_s9 = sphi %s1438_s9, %s1707_s9  }
   0x4   : > { %s1461_s15 = sadd.s32 1, %s1417_s12   ;;  %s69_s16 = sadd.s32 1, %s1413_s11 }
   0x5   : > { %s66_s17 = ssub.s32 %s1417_s12, %s1461_s15  ;;  %p79_p0 = scmp.ne.s32.totalorder %s1413_s11, %s1409_s10 }
   0x6   : > { %p67_p1 = scmp.eq.s32.totalorder %s66_s17, 0  ;;  %p80_p2 = scmp.eq.s32.totalorder %s1016_s13, 1 }
   0x7   : > { %p85_p3 = scmp.ne.s32.totalorder %s1409_s10, %s1405_s9  ;;  %p86_p4 = scmp.eq.s32.totalorder %s1017_s14, 1 }
   0x8   : > { %s1471_s18 = scalar_select %p67_p1, %s1413_s11, %s69_s16  }
   0x9   : > { %p1473_p5 = por %p80_p2, %p79_p0  ;;  %p1477_p6 = por %p86_p4, %p85_p3 }
   0xa   : > { %p1020_p7 = scmp.ge.s32.totalorder %s1417_s12, 1  ;;  %p116_p8 = scmp.lt.s32.totalorder %s1417_s12, 3 }
   0xc   : > { %p117_p9 = pnand %p1020_p7, %p116_p8 }
   0xd   : > { %s1489_s25 = sshll.u32 (!%p117_p9), %s1016_s13, 4  ;;  %s135_s3 = sand.u32 (!%p117_p9), 1, %s1409_s10  }
   0xe   : > { %120 = sbr.rel (%p117_p9) target bundleno = 924 (0x39c), region = 28  ;;  %p138_p10 = scmp.lt.s32.totalorder (!%p117_p9), %s1489_s25, 31 }
   0xf   : > { %s1667_s8 = scalar_lea.hbm (!%p117_p9), %s1704_s2, %s1489_s25  ;;  %s1422_s16 = smov (!%p117_p9), [#allocation2]  }
  0x13   : > { %v162_v0 = vld [vmem:[%s1703_s1 + $0x18] sm:$0xff]  ;;  %v161_v1 = vld [vmem:[%s1703_s1 + $0x10] sm:$0xff]  ;;  %v160_v4 = vld [vmem:[%s1703_s1 + $0x8] sm:$0xff]  ;;  %s139_s4 = scalar_select %p138_p10, %s1489_s25, 31  ;;  %vm168_vm0 = vcmask 261120   ;;  %vm391_vm1 = vcmask 523264  }
  0x14   : > { %1175 = vmatprep.subr.mxu0 %v162_v0  ;;  %v385_v2 = vld [vmem:[%s1703_s1 + $0x58] sm:$0xff]  ;;  %v384_v3 = vld [vmem:[%s1703_s1 + $0x50] sm:$0xff]  ;;  %v383_v5 = vld [vmem:[%s1703_s1 + $0x48] sm:$0xff]  ;;  %vm1420_vm2 = vmmov 0   ;;  %vm826_vm3 = vcmask 130048  }
  0x15   : > { %1176 = vmatpush3.msra.mxu0 %v162_v0  ;;  %1207 = vmatprep.subr.mxu1 %v385_v2  ;;  %v159_v6 = vld [vmem:[%s1703_s1] sm:$0xff]  ;;  %s1022_s13 = sshll.u32 %s139_s4, 3  ;;  %v381_v24 = vld [vmem:[%s1703_s1 + $0x38] sm:$0xff]  ;;  %v380_v25 = vld [vmem:[%s1703_s1 + $0x30] sm:$0xff]  ;;  %s136_s4 = scalar_lea.vmem [#allocation2], %s135_s3 }
  0x16   : > { %1177 = vmatprep.subr.mxu0 %v161_v1  ;;  %1208 = vmatpush3.msra.mxu1 %v385_v2  ;;  %s1511_s17 = scalar_lea.vmem %s1702_s0, %s1022_s13  ;;  %v382_v7 = vld [vmem:[%s1703_s1 + $0x40] sm:$0xff]  ;;  %v379_v26 = vld [vmem:[%s1703_s1 + $0x28] sm:$0xff]  ;;  %v604_v28 = vld [vmem:[%s1703_s1 + $0x78] sm:$0xff]  ;;  %s962_s5 = sshll.u32 %s136_s4, 4  ;;  %s963_s5 = int_to_ptr.vmem [resolvable:$true] %s962_s5 }
  0x17   : > { %1178 = vmatpush3.msra.mxu0 %v161_v1  ;;  %1209 = vmatprep.subr.mxu1 %v384_v3  ;;  %v143_v8 = vld [vmem:[%s1511_s17] sm:$0xff]  ;;  %v144_v9 = vld [vmem:[%s1511_s17 + $0x8] sm:$0xff]  ;;  %v145_v10 = vld [vmem:[%s1511_s17 + $0x10] sm:$0xff]  ;;  %s950_s13 = scalar_lea.sflag [#allocation3], %s135_s3  ;;  %s1357_s14 = scalar_lea.vmem %s963_s5, 16 }
  0x18   : > { %1179 = vmatprep.subr.mxu0 %v160_v4  ;;  %1210 = vmatpush3.msra.mxu1 %v384_v3  ;;  %v146_v11 = vld [vmem:[%s1511_s17 + $0x18] sm:$0xff]  ;;  %v147_v12 = vld [vmem:[%s1511_s17 + $0x20] sm:$0xff]  ;;  %v148_v13 = vld [vmem:[%s1511_s17 + $0x28] sm:$0xff]  ;;  %p1358_p11 = scmp.ne.s32.totalorder %s963_s5, %s1357_s14 }
  0x19   : > { %1180 = vmatpush3.msra.mxu0 %v160_v4  ;;  %1211 = vmatprep.subr.mxu1 %v383_v5  ;;  %v149_v14 = vld [vmem:[%s1511_s17 + $0x30] sm:$0xff]  ;;  %v150_v15 = vld [vmem:[%s1511_s17 + $0x38] sm:$0xff]  ;;  %v151_v16 = vld [vmem:[%s1511_s17 + $0x40] sm:$0xff] }
  0x1a   : > { %1181 = vmatprep.subr.mxu0 %v159_v6  ;;  %1212 = vmatpush3.msra.mxu1 %v383_v5  ;;  %v152_v17 = vld [vmem:[%s1511_s17 + $0x48] sm:$0xff]  ;;  %v153_v18 = vld [vmem:[%s1511_s17 + $0x50] sm:$0xff]  ;;  %v154_v19 = vld [vmem:[%s1511_s17 + $0x58] sm:$0xff]  ;;  %p1359_p12 = pnand %p1358_p11, %p1473_p5 }
  0x1b   : > { %1182 = vmatpush3.msra.mxu0 %v159_v6  ;;  %1183 = vmatprep.mubr.msk.f32.mxu0 %vm168_vm0, %v143_v8  ;;  %v155_v20 = vld [vmem:[%s1511_s17 + $0x60] sm:$0xff]  ;;  %v156_v21 = vld [vmem:[%s1511_s17 + $0x68] sm:$0xff]  ;;  %v157_v22 = vld [vmem:[%s1511_s17 + $0x70] sm:$0xff] }
  0x1c   : > { %1184 = vmatmul.mubr.msk.f32.vlgmr.msra.gmra.mxu0 %vm168_vm0, %v144_v9  ;;  %1213 = vmatprep.subr.mxu1 %v382_v7  ;;  %v158_v23 = vld [vmem:[%s1511_s17 + $0x78] sm:$0xff]  ;;  %v378_v27 = vld [vmem:[%s1703_s1 + $0x20] sm:$0xff]  ;;  %v603_v29 = vld [vmem:[%s1703_s1 + $0x70] sm:$0xff]  ;;  %p1360_p13 = pneg %p1359_p12  ;;  %s1361_s17 = sshll.u32 %s1422_s16, 4  ;;  %s1362_s17 = int_to_ptr.vmem [resolvable:$false] %s1361_s17 }
  0x1d   : > { %1186 = vmatprep.mubr.msk.f32.mxu0 %vm168_vm0, %v145_v10  ;;  %1214 = vmatpush3.msra.mxu1 %v382_v7  ;;  %v602_v30 = vld [vmem:[%s1703_s1 + $0x68] sm:$0xff]  ;;  %v601_v31 = vld [vmem:[%s1703_s1 + $0x60] sm:$0xff]  ;;  %s1363_s21 = scalar_lea.vmem %s1362_s17, 32  ;;  %p1364_p0 = scmp.lt.s32.totalorder %s963_s5, %s1362_s17 }
  0x1e   : > { %1215 = vmatprep.subr.mxu1 %v381_v24  ;;  %1247 = vmatprep.subr.mxu0 %v604_v28  ;;  %v1023_v32 = vld [vmem:[%s1703_s1 + $0x80] ss:$0 sm:$0xff]  ;;  %p1365_p1 = scmp.lt.s32.totalorder %s1363_s21, %s1357_s14 }
  0x1f   : > { %1216 = vmatpush3.msra.mxu1 %v381_v24  ;;  %1248 = vmatpush3.msra.mxu0 %v604_v28 }
  0x20   : > { %1187 = vmatmul.mubr.msk.f32.gmra.mxu0 %vm168_vm0, %v146_v11  ;;  %1217 = vmatprep.subr.mxu1 %v380_v25  ;;  %p1366_p2 = por %p1365_p1, %p1364_p0 }
  0x21   : > { %1189 = vmatprep.mubr.msk.f32.mxu0 %vm168_vm0, %v147_v12  ;;  %1218 = vmatpush3.msra.mxu1 %v380_v25 }
  0x22   : > { %1219 = vmatprep.subr.mxu1 %v379_v26  ;;  %1249 = vmatprep.subr.mxu0 %v603_v29  ;;  %p1367_p3 = pnand %p1366_p2, %p1360_p13 }
  0x23   : > { %1220 = vmatpush3.msra.mxu1 %v379_v26  ;;  %1250 = vmatpush3.msra.mxu0 %v603_v29 }
  0x24   : > { %1190 = vmatmul.mubr.msk.f32.gmra.mxu0 %vm168_vm0, %v148_v13  ;;  %1221 = vmatprep.subr.mxu1 %v378_v27 }
  0x25   : > { %1192 = vmatprep.mubr.msk.f32.mxu0 %vm168_vm0, %v149_v14  ;;  %1222 = vmatpush3.msra.mxu1 %v378_v27 }
  0x26   : > { %1251 = vmatprep.subr.mxu0 %v602_v30 }
  0x27   : > { %1252 = vmatpush3.msra.mxu0 %v602_v30 }
  0x28   : > { %1193 = vmatmul.mubr.msk.f32.gmra.mxu0 %vm168_vm0, %v150_v15  ;;  %1253 = vmatprep.subr.mxu0 %v601_v31 }
  0x29   : > { %1195 = vmatprep.mubr.msk.f32.mxu0 %vm168_vm0, %v151_v16  ;;  %1254 = vmatpush3.msra.mxu0 %v601_v31 }
  0x2c   : > { %1196 = vmatmul.mubr.msk.f32.gmra.mxu0 %vm168_vm0, %v152_v17  ;;  %v1040_v17 = vld [vmem:[%s1703_s1 + $0x81] ss:$0 sm:$0xff] }
  0x2d   : > { %1198 = vmatprep.mubr.msk.f32.mxu0 %vm168_vm0, %v153_v18 }
  0x30   : > { %1199 = vmatmul.mubr.msk.f32.gmra.mxu0 %vm168_vm0, %v154_v19 }
  0x31   : > { %1201 = vmatprep.mubr.msk.f32.mxu0 %vm168_vm0, %v155_v20 }
  0x34   : > { %1202 = vmatmul.mubr.msk.f32.gmra.mxu0 %vm168_vm0, %v156_v21 }
  0x35   : > { %1204 = vmatprep.mubr.msk.f32.mxu0 %vm168_vm0, %v157_v22 }
  0x38   : > { %1205 = vmatmul.mubr.msk.f32.gmra.mxu0 %vm168_vm0, %v158_v23 }
  0xdc   : > { %v1185_v33 = vpop.f32.mrf.mxu0 }
  0xdd   : > { %v289_v34 = vadd.f32 %v1185_v33, %v1023_v32 }
  0xde   : > { %v283_v35 = vpop.f32.mrf.mxu0 }
  0xdf   : > { %v284_v36 = vadd.f32 %v1023_v32, %v283_v35  ;;  %v363_v39 = vmax.f32 %v289_v34, 0.0 }
  0xe0   : > { %v1188_v37 = vpop.f32.mrf.mxu0 }
  0xe1   : > { %v362_v38 = vmax.f32 %v284_v36, 0.0  ;;  %v299_v40 = vadd.f32 %v1188_v37, %v1023_v32 }
  0xe2   : > { %v293_v41 = vpop.f32.mrf.mxu0 }
  0xe3   : > { %v294_v42 = vadd.f32 %v1023_v32, %v293_v41  ;;  %1223 = vmatprep.mubr.msk.f32.mxu1 %vm391_vm1, %v362_v38  ;;  %v365_v45 = vmax.f32 %v299_v40, 0.0 }
  0xe4   : > { %v1191_v43 = vpop.f32.mrf.mxu0  ;;  %1224 = vmatmul.mubr.msk.f32.vlgmr.msra.gmra.mxu1 %vm391_vm1, %v363_v39 }
  0xe5   : > { %v364_v44 = vmax.f32 %v294_v42, 0.0  ;;  %v309_v46 = vadd.f32 %v1191_v43, %v1023_v32 }
  0xe6   : > { %v303_v47 = vpop.f32.mrf.mxu0 }
  0xe7   : > { %v304_v48 = vadd.f32 %v1023_v32, %v303_v47  ;;  %1226 = vmatprep.mubr.msk.f32.mxu1 %vm391_vm1, %v364_v44  ;;  %v367_v51 = vmax.f32 %v309_v46, 0.0 }
  0xe8   : > { %v1194_v49 = vpop.f32.mrf.mxu0  ;;  %1227 = vmatmul.mubr.msk.f32.gmra.mxu1 %vm391_vm1, %v365_v45 }
  0xe9   : > { %v366_v50 = vmax.f32 %v304_v48, 0.0  ;;  %v319_v52 = vadd.f32 %v1194_v49, %v1023_v32 }
  0xea   : > { %v313_v53 = vpop.f32.mrf.mxu0 }
  0xeb   : > { %v314_v54 = vadd.f32 %v1023_v32, %v313_v53  ;;  %1229 = vmatprep.mubr.msk.f32.mxu1 %vm391_vm1, %v366_v50  ;;  %v369_v57 = vmax.f32 %v319_v52, 0.0 }
  0xec   : > { %v1197_v55 = vpop.f32.mrf.mxu0  ;;  %1230 = vmatmul.mubr.msk.f32.gmra.mxu1 %vm391_vm1, %v367_v51 }
  0xed   : > { %v368_v56 = vmax.f32 %v314_v54, 0.0  ;;  %v329_v58 = vadd.f32 %v1197_v55, %v1023_v32 }
  0xee   : > { %v323_v59 = vpop.f32.mrf.mxu0 }
  0xef   : > { %v324_v60 = vadd.f32 %v1023_v32, %v323_v59  ;;  %1232 = vmatprep.mubr.msk.f32.mxu1 %vm391_vm1, %v368_v56  ;;  %v371_v63 = vmax.f32 %v329_v58, 0.0 }
  0xf0   : > { %v1200_v61 = vpop.f32.mrf.mxu0  ;;  %1233 = vmatmul.mubr.msk.f32.gmra.mxu1 %vm391_vm1, %v369_v57 }
  0xf1   : > { %v370_v62 = vmax.f32 %v324_v60, 0.0  ;;  %v339_v0 = vadd.f32 %v1200_v61, %v1023_v32 }
  0xf2   : > { %v333_v1 = vpop.f32.mrf.mxu0 }
  0xf3   : > { %v334_v2 = vadd.f32 %v1023_v32, %v333_v1  ;;  %1235 = vmatprep.mubr.msk.f32.mxu1 %vm391_vm1, %v370_v62  ;;  %v373_v5 = vmax.f32 %v339_v0, 0.0 }
  0xf4   : > { %v1203_v3 = vpop.f32.mrf.mxu0  ;;  %1236 = vmatmul.mubr.msk.f32.gmra.mxu1 %vm391_vm1, %v371_v63 }
  0xf5   : > { %v372_v4 = vmax.f32 %v334_v2, 0.0  ;;  %v349_v6 = vadd.f32 %v1203_v3, %v1023_v32  ;;  %v1419_v2 = vmov 0.0   ;;  %v820_v3 = vld [vmem:[%s1703_s1 + $0x84] sm:$0x1] }
  0xf6   : > { %v343_v7 = vpop.f32.mrf.mxu0  ;;  %1279 = vmatprep.subr.mxu1 %v1419_v2 }
  0xf7   : > { %v344_v8 = vadd.f32 %v1023_v32, %v343_v7  ;;  %1238 = vmatprep.mubr.msk.f32.mxu1 %vm391_vm1, %v372_v4  ;;  %v375_v11 = vmax.f32 %v349_v6, 0.0  ;;  %v1421_v4 = vmov 0  }
  0xf8   : > { %v1206_v9 = vpop.f32.mrf.mxu0  ;;  %1239 = vmatmul.mubr.msk.f32.gmra.mxu1 %vm391_vm1, %v373_v5  ;;  %1356 = vset.pattern.permute.xlu0 %v1421_v4 }
  0xf9   : > { %v374_v10 = vmax.f32 %v344_v8, 0.0  ;;  %v359_v12 = vadd.f32 %v1206_v9, %v1023_v32  ;;  %823 = vperm.xlu0 %1356, %v820_v3  }
  0xfa   : > { %v353_v13 = vpop.f32.mrf.mxu0 }
  0xfb   : > { %v354_v14 = vadd.f32 %v1023_v32, %v353_v13  ;;  %1241 = vmatprep.mubr.msk.f32.mxu1 %vm391_vm1, %v374_v10  ;;  %v377_v16 = vmax.f32 %v359_v12, 0.0 }
  0xfc   : > { %1242 = vmatmul.mubr.msk.f32.gmra.mxu1 %vm391_vm1, %v375_v11 }
  0xfd   : > { %v376_v15 = vmax.f32 %v354_v14, 0.0 }
  0xff   : > { %1244 = vmatprep.mubr.msk.f32.mxu1 %vm391_vm1, %v376_v15 }
 0x100   : > { %1245 = vmatmul.mubr.msk.f32.gmra.mxu1 %vm391_vm1, %v377_v16 }
 0x101   : > { %1311 = vmatprep.mubr.msk.f32.mxu1 %vm1420_vm2, %v1419_v2 }
 0x1a4   : > { %v1225_v18 = vpop.f32.mrf.mxu1 }
 0x1a5   : > { %v512_v19 = vadd.f32 %v1225_v18, %v1040_v17 }
 0x1a6   : > { %v506_v20 = vpop.f32.mrf.mxu1 }
 0x1a7   : > { %v507_v21 = vadd.f32 %v1040_v17, %v506_v20  ;;  %v586_v24 = vmax.f32 %v512_v19, 0.0  ;;  %v1057_v19 = vld [vmem:[%s1703_s1 + $0x82] ss:$0 sm:$0xff] }
 0x1a8   : > { %v1228_v22 = vpop.f32.mrf.mxu1 }
 0x1a9   : > { %v585_v23 = vmax.f32 %v507_v21, 0.0  ;;  %v522_v25 = vadd.f32 %v1228_v22, %v1040_v17 }
 0x1aa   : > { %v516_v26 = vpop.f32.mrf.mxu1 }
 0x1ab   : > { %v517_v27 = vadd.f32 %v1040_v17, %v516_v26  ;;  %1255 = vmatprep.mubr.msk.f32.mxu0 %vm168_vm0, %v585_v23  ;;  %v588_v30 = vmax.f32 %v522_v25, 0.0 }
 0x1ac   : > { %v1231_v28 = vpop.f32.mrf.mxu1  ;;  %1256 = vmatmul.mubr.msk.f32.vlgmr.msra.gmra.mxu0 %vm168_vm0, %v586_v24 }
 0x1ad   : > { %v587_v29 = vmax.f32 %v517_v27, 0.0  ;;  %v532_v31 = vadd.f32 %v1231_v28, %v1040_v17 }
 0x1ae   : > { %v526_v32 = vpop.f32.mrf.mxu1 }
 0x1af   : > { %v527_v33 = vadd.f32 %v1040_v17, %v526_v32  ;;  %1258 = vmatprep.mubr.msk.f32.mxu0 %vm168_vm0, %v587_v29  ;;  %v590_v36 = vmax.f32 %v532_v31, 0.0 }
 0x1b0   : > { %v1234_v34 = vpop.f32.mrf.mxu1  ;;  %1259 = vmatmul.mubr.msk.f32.gmra.mxu0 %vm168_vm0, %v588_v30 }
 0x1b1   : > { %v589_v35 = vmax.f32 %v527_v33, 0.0  ;;  %v542_v37 = vadd.f32 %v1234_v34, %v1040_v17 }
 0x1b2   : > { %v536_v38 = vpop.f32.mrf.mxu1 }
 0x1b3   : > { %v537_v39 = vadd.f32 %v1040_v17, %v536_v38  ;;  %1261 = vmatprep.mubr.msk.f32.mxu0 %vm168_vm0, %v589_v35  ;;  %v592_v42 = vmax.f32 %v542_v37, 0.0 }
 0x1b4   : > { %v1237_v40 = vpop.f32.mrf.mxu1  ;;  %1262 = vmatmul.mubr.msk.f32.gmra.mxu0 %vm168_vm0, %v590_v36 }
 0x1b5   : > { %v591_v41 = vmax.f32 %v537_v39, 0.0  ;;  %v552_v43 = vadd.f32 %v1237_v40, %v1040_v17 }
 0x1b6   : > { %v546_v44 = vpop.f32.mrf.mxu1 }
 0x1b7   : > { %v547_v45 = vadd.f32 %v1040_v17, %v546_v44  ;;  %1264 = vmatprep.mubr.msk.f32.mxu0 %vm168_vm0, %v591_v41  ;;  %v594_v48 = vmax.f32 %v552_v43, 0.0 }
 0x1b8   : > { %v1240_v46 = vpop.f32.mrf.mxu1  ;;  %1265 = vmatmul.mubr.msk.f32.gmra.mxu0 %vm168_vm0, %v592_v42 }
 0x1b9   : > { %v593_v47 = vmax.f32 %v547_v45, 0.0  ;;  %v562_v49 = vadd.f32 %v1240_v46, %v1040_v17 }
 0x1ba   : > { %v556_v50 = vpop.f32.mrf.mxu1 }
 0x1bb   : > { %v557_v51 = vadd.f32 %v1040_v17, %v556_v50  ;;  %1267 = vmatprep.mubr.msk.f32.mxu0 %vm168_vm0, %v593_v47  ;;  %v596_v54 = vmax.f32 %v562_v49, 0.0 }
 0x1bc   : > { %v1243_v52 = vpop.f32.mrf.mxu1  ;;  %1268 = vmatmul.mubr.msk.f32.gmra.mxu0 %vm168_vm0, %v594_v48 }
 0x1bd   : > { %v595_v53 = vmax.f32 %v557_v51, 0.0  ;;  %v572_v55 = vadd.f32 %v1243_v52, %v1040_v17 }
 0x1be   : > { %v566_v56 = vpop.f32.mrf.mxu1 }
 0x1bf   : > { %v567_v57 = vadd.f32 %v1040_v17, %v566_v56  ;;  %1270 = vmatprep.mubr.msk.f32.mxu0 %vm168_vm0, %v595_v53  ;;  %v598_v60 = vmax.f32 %v572_v55, 0.0  ;;  %v824_v55 = vpop.permute.xlu0 %823 }
 0x1c0   : > { %v1246_v58 = vpop.f32.mrf.mxu1  ;;  %1271 = vmatmul.mubr.msk.f32.gmra.mxu0 %vm168_vm0, %v596_v54  ;;  %v819_v54 = vld [vmem:[%s1703_s1 + $0x83] sm:$0x1] }
 0x1c1   : > { %v597_v59 = vmax.f32 %v567_v57, 0.0  ;;  %v582_v61 = vadd.f32 %v1246_v58, %v1040_v17 }
 0x1c2   : > { %v576_v62 = vpop.f32.mrf.mxu1 }
 0x1c3   : > { %v577_v63 = vadd.f32 %v1040_v17, %v576_v62  ;;  %1273 = vmatprep.mubr.msk.f32.mxu0 %vm168_vm0, %v597_v59  ;;  %v600_v1 = vmax.f32 %v582_v61, 0.0 }
 0x1c4   : > { %1274 = vmatmul.mubr.msk.f32.gmra.mxu0 %vm168_vm0, %v598_v60 }
 0x1c5   : > { %v599_v0 = vmax.f32 %v577_v63, 0.0 }
 0x1c7   : > { %1276 = vmatprep.mubr.msk.f32.mxu0 %vm168_vm0, %v599_v0 }
 0x1c8   : > { %1277 = vmatmul.mubr.msk.f32.gmra.mxu0 %vm168_vm0, %v600_v1 }
 0x26c   : > { %v1615_v5 = vpop.f32.mrf.mxu0 }
 0x26d   : > { %v730_v49 = vadd.f32 %v1615_v5, %v1057_v19 }
 0x26e   : > { %v1617_v6 = vpop.f32.mrf.mxu0 }
 0x26f   : > { %v804_v51 = vmax.f32 %v730_v49, 0.0  ;;  %v725_v52 = vadd.f32 %v1057_v19, %v1617_v6 }
 0x270   : > { %v1260_v7 = vpop.f32.mrf.mxu0 }
 0x271   : > { %v740_v45 = vadd.f32 %v1260_v7, %v1057_v19  ;;  %v803_v53 = vmax.f32 %v725_v52, 0.0 }
 0x272   : > { %v1619_v8 = vpop.f32.mrf.mxu0 }
 0x273   : > { %v806_v47 = vmax.f32 %v740_v45, 0.0  ;;  %v735_v48 = vadd.f32 %v1057_v19, %v1619_v8 }
 0x274   : > { %v1263_v9 = vpop.f32.mrf.mxu0 }
 0x275   : > { %v750_v41 = vadd.f32 %v1263_v9, %v1057_v19  ;;  %v805_v50 = vmax.f32 %v735_v48, 0.0 }
 0x276   : > { %v744_v10 = vpop.f32.mrf.mxu0 }
 0x277   : > { %v808_v43 = vmax.f32 %v750_v41, 0.0  ;;  %v745_v44 = vadd.f32 %v1057_v19, %v744_v10 }
 0x278   : > { %v1266_v11 = vpop.f32.mrf.mxu0 }
 0x279   : > { %v760_v37 = vadd.f32 %v1266_v11, %v1057_v19  ;;  %v807_v46 = vmax.f32 %v745_v44, 0.0 }
 0x27a   : > { %v754_v12 = vpop.f32.mrf.mxu0 }
 0x27b   : > { %v810_v39 = vmax.f32 %v760_v37, 0.0  ;;  %v755_v40 = vadd.f32 %v1057_v19, %v754_v12 }
 0x27c   : > { %v1269_v13 = vpop.f32.mrf.mxu0 }
 0x27d   : > { %v770_v33 = vadd.f32 %v1269_v13, %v1057_v19  ;;  %v809_v42 = vmax.f32 %v755_v40, 0.0 }
 0x27e   : > { %v764_v14 = vpop.f32.mrf.mxu0 }
 0x27f   : > { %v812_v35 = vmax.f32 %v770_v33, 0.0  ;;  %v765_v36 = vadd.f32 %v1057_v19, %v764_v14 }
 0x280   : > { %v1272_v15 = vpop.f32.mrf.mxu0 }
 0x281   : > { %v780_v29 = vadd.f32 %v1272_v15, %v1057_v19  ;;  %v811_v38 = vmax.f32 %v765_v36, 0.0 }
 0x282   : > { %v774_v16 = vpop.f32.mrf.mxu0 }
 0x283   : > { %v814_v31 = vmax.f32 %v780_v29, 0.0  ;;  %v775_v32 = vadd.f32 %v1057_v19, %v774_v16 }
 0x284   : > { %v1275_v17 = vpop.f32.mrf.mxu0 }
 0x285   : > { %v790_v25 = vadd.f32 %v1275_v17, %v1057_v19  ;;  %v813_v34 = vmax.f32 %v775_v32, 0.0 }
 0x286   : > { %v784_v18 = vpop.f32.mrf.mxu0 }
 0x287   : > { %v816_v27 = vmax.f32 %v790_v25, 0.0  ;;  %v785_v28 = vadd.f32 %v1057_v19, %v784_v18 }
 0x288   : > { %v1278_v20 = vpop.f32.mrf.mxu0 }
 0x289   : > { %v800_v21 = vadd.f32 %v1278_v20, %v1057_v19  ;;  %v815_v30 = vmax.f32 %v785_v28, 0.0 }
 0x28a   : > { %v794_v22 = vpop.f32.mrf.mxu0 }
 0x28b   : > { %v818_v23 = vmax.f32 %v800_v21, 0.0  ;;  %v795_v24 = vadd.f32 %v1057_v19, %v794_v22 }
 0x28d   : > { %1280 = vmatpush3.xpose.msk.msra.mxu1 %vm826_vm3, %v818_v23  ;;  %v817_v26 = vmax.f32 %v795_v24, 0.0 }
 0x28e   : > { %1281 = vmatprep.subr.mxu1 %v1419_v2 }
 0x291   : > { %1282 = vmatpush3.xpose.msk.msra.mxu1 %vm826_vm3, %v817_v26 }
 0x292   : > { %1283 = vmatprep.subr.mxu1 %v1419_v2 }
 0x295   : > { %1284 = vmatpush3.xpose.msk.msra.mxu1 %vm826_vm3, %v816_v27 }
 0x296   : > { %1285 = vmatprep.subr.mxu1 %v1419_v2 }
 0x299   : > { %1286 = vmatpush3.xpose.msk.msra.mxu1 %vm826_vm3, %v815_v30 }
 0x29a   : > { %1287 = vmatprep.subr.mxu1 %v1419_v2 }
 0x29d   : > { %1288 = vmatpush3.xpose.msk.msra.mxu1 %vm826_vm3, %v814_v31 }
 0x29e   : > { %1289 = vmatprep.subr.mxu1 %v1419_v2 }
 0x2a1   : > { %1290 = vmatpush3.xpose.msk.msra.mxu1 %vm826_vm3, %v813_v34 }
 0x2a2   : > { %1291 = vmatprep.subr.mxu1 %v1419_v2 }
 0x2a5   : > { %1292 = vmatpush3.xpose.msk.msra.mxu1 %vm826_vm3, %v812_v35 }
 0x2a6   : > { %1293 = vmatprep.subr.mxu1 %v1419_v2 }
 0x2a9   : > { %1294 = vmatpush3.xpose.msk.msra.mxu1 %vm826_vm3, %v811_v38 }
 0x2aa   : > { %1295 = vmatprep.subr.mxu1 %v1419_v2 }
 0x2ad   : > { %1296 = vmatpush3.xpose.msk.msra.mxu1 %vm826_vm3, %v810_v39 }
 0x2ae   : > { %1297 = vmatprep.subr.mxu1 %v1419_v2 }
 0x2b1   : > { %1298 = vmatpush3.xpose.msk.msra.mxu1 %vm826_vm3, %v809_v42 }
 0x2b2   : > { %1299 = vmatprep.subr.mxu1 %v1419_v2 }
 0x2b5   : > { %1300 = vmatpush3.xpose.msk.msra.mxu1 %vm826_vm3, %v808_v43 }
 0x2b6   : > { %1301 = vmatprep.subr.mxu1 %v1419_v2 }
 0x2b9   : > { %1302 = vmatpush3.xpose.msk.msra.mxu1 %vm826_vm3, %v807_v46 }
 0x2ba   : > { %1303 = vmatprep.subr.mxu1 %v1419_v2 }
 0x2bd   : > { %1304 = vmatpush3.xpose.msk.msra.mxu1 %vm826_vm3, %v806_v47 }
 0x2be   : > { %1305 = vmatprep.subr.mxu1 %v1419_v2 }
 0x2c1   : > { %1306 = vmatpush3.xpose.msk.msra.mxu1 %vm826_vm3, %v805_v50 }
 0x2c2   : > { %1307 = vmatprep.subr.mxu1 %v1419_v2 }
 0x2c5   : > { %1308 = vmatpush3.xpose.msk.msra.mxu1 %vm826_vm3, %v804_v51 }
 0x2c6   : > { %1309 = vmatprep.subr.mxu1 %v1419_v2 }
 0x2c9   : > { %1310 = vmatpush3.xpose.msk.msra.mxu1 %vm826_vm3, %v803_v53 }
 0x2cc   : > { %1312 = vmatmul.mubr.msk.f32.vlgmr.msra.gmra.mxu1 %vm826_vm3, %v819_v54 }
 0x38c   : > { %v944_v56 = vpop.f32.mrf.mxu1 }
 0x38d   : > { %v945_v57 = vadd.f32 %v944_v56, %v824_v55 }
 0x38e   : > { %v1313_v58 = vpop.f32.mrf.mxu1 }
 0x38f   : > { %948 = vst [vmem:[%s136_s4] sm:$0x1] %v945_v57 }
 0x390   : > { %1370 = shalt.err (!%p1367_p3)
}
 0x391   : > { %s1371_s25 = scalar_lea.hbm %s1667_s8, 16  ;;  %s1375_s24 = scalar_lea.hbm %s1704_s2, 32 }
 0x392   : > { %p1372_p4 = scmp.ne.s32.totalorder %s1667_s8, %s1371_s25  ;;  %p1376_p9 = scmp.lt.s32.totalorder %s1667_s8, %s1704_s2 }
 0x393   : > { %p1377_p10 = scmp.lt.s32.totalorder %s1375_s24, %s1371_s25 }
 0x394   : > { %p1373_p7 = pnand %p1372_p4, %p1473_p5 }
 0x395   : > { %p1378_p11 = por %p1377_p10, %p1376_p9 }
 0x396   : > { %p1374_p8 = pneg %p1373_p7 }
 0x398   : > { %p1379_p12 = pnand %p1378_p11, %p1374_p8 }
 0x39a   : > { %1382 = shalt.err (!%p1379_p12)
}
 0x39b   : > { %1314 = dma.vmem_to_hbm [thread:$0]  (%p1473_p5), %s963_s5, 16, %s1667_s8, %s950_s13  }
 0x39c PF: > { %p1320_p13 = scmp.ge.s32.totalorder %s1417_s12, 2  ;;  %s974_s28 = sand.u32 1, %s1405_s9  }
 0x39d   : > { %s975_s29 = scalar_lea.sflag [#allocation3], %s974_s28 }
 0x39e   : > { %p1317_p0 = pnand %p1320_p13, %p1477_p6 }
 0x3a0   : > { %p1318_p1 = pneg %p1317_p0 }
 0x3a2   : > { %1400 = dma.done.wait (%p1318_p1), %s975_s29, 16  }
 0x3a3   : > { %1402 = vsyncadd (%p1318_p1), %s975_s29, 4294967280  ;;  %p12_p2 = scmp.ge.s32.totalorder %s1461_s15, 4   ;;  %s1707_s9 = smov %s1409_s10 }
 0x3a4   : > { %s1708_s10 = smov %s1413_s11  ;;  %s1709_s11 = smov %s1471_s18 }
 0x3a5   : > { %s1710_s12 = smov %s1461_s15  ;;  %14 = sbr.rel (!%p12_p2) target bundleno = 3 (0x3), region = 63 }
 0x3aa   :  { %979 = vsyncpa [#allocation3], 1 }
 0x3ab   :  { %981 = vsyncpa [#allocation3 + $0x1], 1 }

</bundles_post_ra>
